<compile_context>
chip_gen: v7x
topology: tpu7x:2x2x1
jax: 0.10.0
libtpu: 0.0.40
codegen_flags: <defaults>
</compile_context>

<pallas_src>
import functools

import jax
import jax.numpy as jnp
from jax.experimental import pallas as pl
from jax.experimental.pallas import tpu as pltpu


# ---------------------------------------------------------------------------
# Tunables
# ---------------------------------------------------------------------------
_XLA_FAST_PATH_BYTES = 256 << 10   # tiny gathers: XLA take beats pallas launch cost
_P_CHUNK = 512                     # one-hot chunk along the pose-pool axis
_MAX_BLOCK_ROWS = 512              # cap on gathered rows per grid step
_STREAM_ROWS = 32                  # rows per step in the HBM-streaming fallback
_HEADROOM_BYTES = 8 << 20          # VMEM slack for temporaries / compiler scratch


def _tpu_vmem_bytes() -> int:
    """Physical VMEM per TensorCore; conservative (v7x-sized) default on failure."""
    try:
        return int(pltpu.get_tpu_info().vmem_capacity_bytes)
    except Exception:
        return 64 << 20


def _round_up(x: int, m: int) -> int:
    return m * pl.cdiv(x, m)


# ---------------------------------------------------------------------------
# Resident-table path: vectorized one-hot MXU gather
# ---------------------------------------------------------------------------
def _gather_resident_kernel(idx_ref, pose_ref, out_ref, *, p_chunk):
    """out[b, :] = pose[idx[b], :] as a one-hot MXU matmul (dense unmasked store).

    idx_ref : (block_rows, 1) int32, VMEM
    pose_ref: (P_pad, TF) VMEM-resident pose table (constant index_map)
    out_ref : (block_rows, TF)
    """
    block_rows = out_ref.shape[0]
    p_pad = pose_ref.shape[0]
    idx = idx_ref[...]                                         # (block_rows, 1)

    acc = None
    for p0 in range(0, p_pad, p_chunk):                        # static chunk loop
        pc = min(p_chunk, p_pad - p0)
        iota = jax.lax.broadcasted_iota(jnp.int32, (block_rows, pc), 1) + p0
        onehot = jnp.where(idx == iota, jnp.float32(1.0), jnp.float32(0.0))
        part = jax.lax.dot(
            onehot,
            pose_ref[p0:p0 + pc, :].astype(jnp.float32),
            precision=jax.lax.Precision.HIGHEST,               # exact f32 gather
            preferred_element_type=jnp.float32,
        )
        acc = part if acc is None else acc + part
    out_ref[...] = acc.astype(out_ref.dtype)


def _pose_gather_resident(pose2d: jax.Array, idx: jax.Array, vmem_cap: int) -> jax.Array:
    P, TF = pose2d.shape
    N = idx.shape[0]
    itemsize = jnp.dtype(pose2d.dtype).itemsize

    # Pad the pool axis to a sublane multiple so all MXU K dims are aligned.
    p_pad = _round_up(P, 8)
    if p_pad != P:
        pose2d = jnp.pad(pose2d, ((0, p_pad - P), (0, 0)))
    pose_bytes = p_pad * TF * itemsize

    # Size block_rows from remaining VMEM: resident table may be double-buffered
    # by the pipeline (2x), output block is double-buffered, plus an f32
    # accumulator and the one-hot chunk as in-kernel temporaries.
    avail_out = max(0, vmem_cap - 2 * pose_bytes - _HEADROOM_BYTES)
    per_row_bytes = 2 * TF * itemsize + 4 * TF + 4 * _P_CHUNK
    rows_fit = max(8, (avail_out // max(1, per_row_bytes)) // 8 * 8)
    n_pad8 = _round_up(N, 8)
    block_rows = min(_MAX_BLOCK_ROWS, rows_fit, n_pad8)
    # Keep >= 4 parallel grid steps when there is enough work (v7x megacore),
    # but never shrink blocks below 128 rows to do it.
    if n_pad8 >= 4 * 128:
        block_rows = min(block_rows, max(128, _round_up(pl.cdiv(N, 4), 8)))
    block_rows = max(8, block_rows)

    n_pad = block_rows * pl.cdiv(N, block_rows)
    idx_col = jnp.pad(idx, (0, n_pad - N)).reshape(n_pad, 1)   # pad with row 0

    cost = pl.CostEstimate(
        flops=2 * n_pad * p_pad * TF,
        transcendentals=0,
        bytes_accessed=pose_bytes + n_pad * TF * itemsize + n_pad * 4,
    )

    out2d = pl.pallas_call(
        functools.partial(_gather_resident_kernel, p_chunk=_P_CHUNK),
        out_shape=jax.ShapeDtypeStruct((n_pad, TF), pose2d.dtype),
        grid_spec=pltpu.PrefetchScalarGridSpec(
            num_scalar_prefetch=0,
            grid=(n_pad // block_rows,),
            in_specs=[
                # Per-block gather indices as a small VMEM int32 column.
                pl.BlockSpec((block_rows, 1), lambda i: (i, 0)),
                # Whole pose table, constant block index -> fetched from HBM
                # once and kept resident in VMEM across all grid steps.
                pl.BlockSpec((p_pad, TF), lambda i: (0, 0)),
            ],
            out_specs=pl.BlockSpec((block_rows, TF), lambda i: (i, 0)),
        ),
        compiler_params=pltpu.CompilerParams(
            dimension_semantics=("parallel",),   # disjoint output blocks
            vmem_limit_bytes=int(vmem_cap),
        ),
        cost_estimate=cost,
    )(idx_col, pose2d)
    return out2d[:N]


# ---------------------------------------------------------------------------
# Streaming fallback: pose too large for VMEM -> manual double-buffered DMA,
# 32 gathered rows per grid step, one dense (32, TF) store.
# ---------------------------------------------------------------------------
def _gather_stream_kernel(idx_ref, pose_hbm, out_ref, slab, sems):
    g = out_ref.shape[0]
    step = pl.program_id(0)
    nsteps = pl.num_programs(0)

    def issue(s, slot):
        base = s * g
        for r in range(g):                                     # static unroll
            pltpu.make_async_copy(
                pose_hbm.at[pl.ds(idx_ref[base + r], 1), :],
                slab.at[slot, pl.ds(r, 1), :],
                sems.at[slot, r],
            ).start()

    @pl.when(step == 0)
    def _():
        issue(0, 0)

    slot = jax.lax.rem(step, 2)
    for r in range(g):                                         # wait current slab
        pltpu.make_async_copy(
            pose_hbm.at[pl.ds(0, 1), :],
            slab.at[slot, pl.ds(r, 1), :],
            sems.at[slot, r],
        ).wait()

    @pl.when(step + 1 < nsteps)
    def _():
        issue(step + 1, 1 - slot)

    out_ref[...] = slab[slot]


def _pose_gather_stream(pose2d: jax.Array, idx: jax.Array) -> jax.Array:
    P, TF = pose2d.shape
    N = idx.shape[0]
    g = _STREAM_ROWS
    n_pad = g * pl.cdiv(N, g)
    idx_pad = jnp.pad(idx, (0, n_pad - N))
    # TODO(synk): very large N can exceed the SMEM scalar-prefetch ceiling for
    # idx; chunk the gather at the JAX level if that ever becomes a problem.
    out2d = pl.pallas_call(
        _gather_stream_kernel,
        out_shape=jax.ShapeDtypeStruct((n_pad, TF), pose2d.dtype),
        grid_spec=pltpu.PrefetchScalarGridSpec(
            num_scalar_prefetch=1,
            grid=(n_pad // g,),
            in_specs=[pl.BlockSpec(memory_space=pl.ANY)],      # pose stays in HBM
            out_specs=pl.BlockSpec((g, TF), lambda i, idx_ref: (i, 0)),
            scratch_shapes=[
                pltpu.VMEM((2, g, TF), pose2d.dtype),
                pltpu.SemaphoreType.DMA((2, g)),
            ],
        ),
        compiler_params=pltpu.CompilerParams(
            dimension_semantics=("arbitrary",),   # manual cross-step pipeline
        ),
    )(idx_pad, pose2d)
    return out2d[:N]


# ---------------------------------------------------------------------------
# Public gather + module
# ---------------------------------------------------------------------------
def pose_gather(pose: jax.Array, idx: jax.Array, *, force_pallas: bool = False) -> jax.Array:
    """out[i] = pose[idx[i]] (gather along the leading pose axis)."""
    P, T, F = pose.shape
    N = idx.shape[0]
    TF = T * F
    idx = idx.astype(jnp.int32)
    itemsize = jnp.dtype(pose.dtype).itemsize

    if not jnp.issubdtype(pose.dtype, jnp.floating):
        # TODO(synk): integer pose tables would need a widened/exact path; use XLA.
        return jnp.take(pose, idx, axis=0)

    if not force_pallas and N * TF * itemsize <= _XLA_FAST_PATH_BYTES:
        # Fixed pallas_call launch cost dominates tiny gathers.
        return jnp.take(pose, idx, axis=0)

    pose2d = pose.reshape(P, TF)                    # lane-dense rows
    vmem_phys = _tpu_vmem_bytes()
    vmem_cap = min((vmem_phys * 3) // 4, 100 << 20)               # generation-aware
    pose_budget = max(0, (vmem_cap - _HEADROOM_BYTES) // 2)       # table may be 2x-buffered

    if _round_up(P, 8) * TF * itemsize <= pose_budget:
        out2d = _pose_gather_resident(pose2d, idx, vmem_cap)
    else:
        out2d = _pose_gather_stream(pose2d, idx)
    return out2d.reshape(N, T, F)


class RandG:
    """JAX port of Rand_G. Parameters are plain arrays, initialized in-script."""

    def __init__(self):
        # nn.Parameter(torch.zeros(1))
        self.dummy = jnp.zeros((1,), dtype=jnp.float32)

    def forward(self, x, y, key, *, audio, pose, time_steps=None, force_pallas=False):
        del x, audio, time_steps                     # unused, matching PyTorch
        n = y.shape[0]
        # torch.randint(low=0, high=pose.shape[0], size=(y.shape[0],))
        idx = jax.random.randint(key, (n,), 0, pose.shape[0], dtype=jnp.int32)
        out = pose_gather(pose, idx, force_pallas=force_pallas)
        internal_losses = [jnp.sum(self.dummy)]
        return out, internal_losses


if __name__ == "__main__":
    key = jax.random.PRNGKey(0)
    k_x, k_y, k_a, k_p, k_idx, k_p2, k_idx2 = jax.random.split(key, 7)

    # Small shapes consistent with (N, time, frequency) / (N, time, pose_feats).
    N, T, FREQ, POSE_FEATS, P_POOL = 2, 8, 16, 32, 6

    x = jax.random.normal(k_x, (N, T, FREQ), dtype=jnp.float32)
    y = jax.random.normal(k_y, (N, T, POSE_FEATS), dtype=jnp.float32)
    audio = jax.random.normal(k_a, (N, T, FREQ), dtype=jnp.float32)
    pose = jax.random.normal(k_p, (P_POOL, T, POSE_FEATS), dtype=jnp.float32)

    model = RandG()

    # 1) Forward pass through the Pallas gather (forced so the kernel itself
    #    runs even at tiny shapes, where the dispatcher would pick XLA).
    out, internal_losses = model.forward(x, y, k_idx, audio=audio, pose=pose,
                                         force_pallas=True)
    out = jax.block_until_ready(out)
    loss = jax.block_until_ready(internal_losses[0])

    idx_ref = jax.random.randint(k_idx, (N,), 0, pose.shape[0], dtype=jnp.int32)
    expected = pose[idx_ref]
    assert out.shape == (N, T, POSE_FEATS), out.shape
    assert jnp.allclose(out, expected), "gather mismatch (pallas, small)"
    assert float(loss) == 0.0

    # 2) Default dispatch (tiny gather -> XLA fast path) must agree.
    out_xla = jax.block_until_ready(pose_gather(pose, idx_ref))
    assert jnp.allclose(out_xla, expected), "gather mismatch (xla fast path)"

    # 3) Larger gather exercising multi-step grid, index padding and chunked P.
    P2, N2 = 700, 1100
    pose2 = jax.random.normal(k_p2, (P2, T, POSE_FEATS), dtype=jnp.float32)
    idx2 = jax.random.randint(k_idx2, (N2,), 0, P2, dtype=jnp.int32)
    out2 = jax.block_until_ready(pose_gather(pose2, idx2, force_pallas=True))
    assert out2.shape == (N2, T, POSE_FEATS)
    assert jnp.allclose(out2, pose2[idx2]), "gather mismatch (pallas, large)"

    print("KERNEL_OK")
</pallas_src>

<mosaic_0001>
module attributes {stable_mosaic.version = 11 : i64} {
  func.func @_gather_resident_kernel(%arg0: i32, %arg1: memref<8x1xi32, #tpu.memory_space<vmem>>, %arg2: memref<8x256xf32, #tpu.memory_space<vmem>>, %arg3: memref<8x256xf32, #tpu.memory_space<vmem>>) attributes {dimension_semantics = [#tpu.dimension_semantics<parallel>], iteration_bounds = array<i64: 1>, scalar_prefetch = 0 : i64, scratch_operands = 0 : i64, tpu.core_type = #tpu.core_type<tc>, window_params = [{transform_indices = @transform_0, window_bounds = array<i64: 8, 1>}, {pipeline_mode = #tpu.pipeline_mode<synchronous>, transform_indices = @transform_1, window_bounds = array<i64: 8, 256>}, {transform_indices = @transform_2, window_bounds = array<i64: 8, 256>}]} {
    %c0 = arith.constant 0 : index
    %c0_0 = arith.constant 0 : index
    %0 = vector.load %arg1[%c0, %c0_0] : memref<8x1xi32, #tpu.memory_space<vmem>>, vector<8x1xi32>
    %1 = tpu.iota {dimensions = array<i32: 1>} : vector<8x8xi32>
    %c0_i32 = arith.constant 0 : i32
    %2 = vector.broadcast %c0_i32 : i32 to vector<8x8xi32>
    %3 = arith.addi %1, %2 : vector<8x8xi32>
    %4 = vector.broadcast %0 : vector<8x1xi32> to vector<8x8xi32>
    %5 = arith.cmpi eq, %4, %3 : vector<8x8xi32>
    %cst = arith.constant 1.000000e+00 : f32
    %cst_1 = arith.constant 0.000000e+00 : f32
    %6 = vector.broadcast %cst : f32 to vector<8x8xf32>
    %7 = vector.broadcast %cst_1 : f32 to vector<8x8xf32>
    %8 = arith.select %5, %6, %7 : vector<8x8xi1>, vector<8x8xf32>
    %c0_2 = arith.constant 0 : index
    %c0_3 = arith.constant 0 : index
    %9 = vector.load %arg2[%c0_2, %c0_3] : memref<8x256xf32, #tpu.memory_space<vmem>>, vector<8x256xf32>
    %cst_4 = arith.constant dense<0.000000e+00> : vector<8x256xf32>
    %10 = tpu.matmul %8, %9, %cst_4 {dimension_numbers = #tpu.dot_dimension_numbers<[1], [0], [0], [1], [0, 0, 1, 1], [], []>, precision = #tpu.contract_precision<fp32>} : vector<8x8xf32>, vector<8x256xf32>, vector<8x256xf32> -> vector<8x256xf32>
    %c0_5 = arith.constant 0 : index
    %c0_6 = arith.constant 0 : index
    %11 = vector.load %arg3[%c0_5, %c0_6] : memref<8x256xf32, #tpu.memory_space<vmem>>, vector<8x256xf32>
    tpu.vector_store %arg3[%c0_5, %c0_6], %10 {strides = array<i32>} : memref<8x256xf32, #tpu.memory_space<vmem>>, vector<8x256xf32>,
    return
  }
  func.func @transform_0(%arg0: i32) -> (i32, i32) {
    %c0_i32 = arith.constant 0 : i32
    %c0_i32_0 = arith.constant 0 : i32
    return %arg0, %c0_i32 : i32, i32
  }
  func.func @transform_1(%arg0: i32) -> (i32, i32) {
    %c0_i32 = arith.constant 0 : i32
    %c0_i32_0 = arith.constant 0 : i32
    %c0_i32_1 = arith.constant 0 : i32
    return %c0_i32, %c0_i32_0 : i32, i32
  }
  func.func @transform_2(%arg0: i32) -> (i32, i32) {
    %c0_i32 = arith.constant 0 : i32
    %c0_i32_0 = arith.constant 0 : i32
    return %arg0, %c0_i32 : i32, i32
  }
}

</mosaic_0001>

<bundles_post_ra>
// kernel: tpu_custom_call.1
= control target key start
LH: loop header
LB: loop body
LE: loop exit
PB: predicated region body
PF: predicated region fallthrough
CT: control target
= control target key end

     0   :  { %7 = vsyncpa [#allocation3], 0  ;;  %s636_s0 = inlined_call_operand.vmem [shape: s32[8,1], index: 0, kind: input, shape index: {}]   ;;  %s637_s1 = inlined_call_operand.hbm [shape: f32[8,256], index: 1, kind: input, shape index: {}]   ;;  %s638_s2 = inlined_call_operand.hbm [shape: f32[8,256], index: 2, kind: output, shape index: {}]  }
   0x1   :  { %8 = vsyncpa [#allocation4], 0  ;;  %s586_s9 = smov [#allocation2]   ;;  %s538_s13 = scalar_lea.hbm %s637_s1, 256 }
   0x2   :  { %s17_s10 = sshll.u32 %s586_s9, 4  ;;  %p539_p0 = scmp.ne.s32.totalorder %s637_s1, %s538_s13  ;;  %s18_s10 = int_to_ptr.vmem [resolvable:$true] %s17_s10 }
   0x3   :  { %p542_p1 = scmp.lt.u32.totalorder %s538_s13, %s637_s1 }
   0x5   :  { %p544_p2 = pnand %p542_p1, %p539_p0 }
   0x7   :  { %547 = shalt.err (!%p544_p2)
}
   0x8   :  { %s548_s18 = scalar_lea.vmem %s18_s10, 256  ;;  %p553_p4 = scmp.lt.s32.totalorder %s18_s10, %s18_s10 }
   0x9   :  { %p549_p3 = scmp.ne.s32.totalorder %s18_s10, %s548_s18  ;;  %p554_p5 = scmp.lt.s32.totalorder %s548_s18, %s548_s18 }
   0xb   :  { %p555_p6 = por %p554_p5, %p553_p4 }
   0xd   :  { %p556_p7 = pnand %p555_p6, %p549_p3 }
   0xf   :  { %559 = shalt.err (!%p556_p7)
}
  0x10   :  { %20 = dma.hbm_to_vmem [thread:$0]  %s637_s1, 256, %s18_s10, [#allocation3]  }
  0x11   :  { %582 = dma.done.wait [#allocation3], 256  }
  0x12   :  { %583 = vsyncadd [#allocation3], 4294967040  ;;  %v587_v0 = vmov 0   ;;  %v588_v1 = vmov 0.0   ;;  %v24_v2 = vld [vmem:[%s636_s0] sm:$0xff]  ;;  %v33_v3 = vld [vmem:[#allocation2 + $0x8] sm:$0xff]  ;;  %v25_v11 = vlaneseq }
  0x13   :  { %537 = vset.pattern.permute.xlu0 %v587_v0  ;;  %341 = vmatprep.mubr.f32.mxu0 %v588_v1  ;;  %v38_v4 = vand.u32 4294901760, %v33_v3  ;;  %v32_v5 = vld [vmem:[#allocation2] sm:$0xff]  ;;  %vm34_vm0 = vcmask 64512   ;;  %s589_s0 = smov [#allocation5]  }
  0x14   :  { %104 = vmatprep.mubr.f32.mxu1 %v588_v1  ;;  %28 = vperm.xlu0 %537, %v24_v2   ;;  %v40_v6 = vand.u32 4294901760, %v32_v5  ;;  %v26_v12 = vand.u32 127, %v25_v11  ;;  %s511_s1 = sshll.u32 %s589_s0, 4  ;;  %s512_s1 = int_to_ptr.vmem [resolvable:$true] %s511_s1 }
  0x15   :  { %276 = vmatprep.subr.mxu0 %v38_v4  ;;  %39 = vmatprep.subr.mxu1 %v38_v4  ;;  %v117_v7 = vsub.f32 %v33_v3, %v38_v4  ;;  %s560_s23 = scalar_lea.vmem %s512_s1, 256  ;;  %p565_p9 = scmp.lt.s32.totalorder %s512_s1, %s512_s1 }
  0x16   :  { %278 = vmatpush1.msra.mxu0 %v40_v6  ;;  %41 = vmatpush1.msra.mxu1 %v40_v6  ;;  %v123_v13 = vsub.f32 %v32_v5, %v40_v6  ;;  %p561_p8 = scmp.ne.s32.totalorder %s512_s1, %s560_s23  ;;  %p566_p10 = scmp.lt.s32.totalorder %s560_s23, %s560_s23 }
  0x17   :  { %v118_v8 = vand.u32 4294901760, %v117_v7 }
  0x18   :  { %v124_v15 = vand.u32 4294901760, %v123_v13  ;;  %p567_p11 = por %p566_p10, %p565_p9 }
  0x19   :  { %v119_v9 = vsub.f32 %v117_v7, %v118_v8  ;;  %354 = vmatprep.subr.mxu0 %v118_v8 }
  0x1a   :  { %v125_v19 = vsub.f32 %v123_v13, %v124_v15  ;;  %p568_p12 = pnand %p567_p11, %p561_p8 }
  0x1b   :  { %v120_v10 = vand.u32 4294901760, %v119_v9 }
  0x1c   :  { %v126_v22 = vand.u32 4294901760, %v125_v19 }
  0x1d   :  { %121 = vmatprep.subr.mxu1 %v120_v10 }
  0x93   :  { %v29_v14 = vpop.permute.xlu0 %28 }
  0x94   :  { %vm30_vm1 = vcmp.eq.s32.totalorder %v29_v14, %v26_v12 }
  0x95   :  { %v31_v16 = vsel %vm30_vm1, 1.0, %v588_v1 }
  0x96   :  { %v36_v17 = vsel %vm34_vm0, %v31_v16, 0 }
  0x97   :  { %v106_v18 = vsub.f32 %v36_v17, %v36_v17 }
  0x99   :  { %v107_v20 = vand.u32 4294901760, %v106_v18 }
  0x9b   :  { %345 = vmatmul.mubr.f32.vlgmr.msra.gmra.mrb[0].mxu0 %v107_v20  ;;  %v108_v21 = vsub.f32 %v106_v18, %v107_v20 }
  0x9c   :  { %358 = vmatpush1.msra.mxu0 %v124_v15  ;;  %421 = vmatprep.mubr.f32.mxu0 %v588_v1 }
  0x9d   :  { %v109_v23 = vand.u32 4294901760, %v108_v21  ;;  %430 = vmatprep.subr.mxu0 %v38_v4 }
  0x9f   :  { %110 = vmatmul.mubr.f32.vlgmr.msra.gmra.mrb[0].mxu1 %v109_v23 }
  0xa0   :  { %127 = vmatpush1.msra.mxu1 %v126_v22  ;;  %190 = vmatprep.mubr.f32.mxu1 %v588_v1 }
  0xa1   :  { %200 = vmatprep.subr.mxu1 %v117_v7 }
  0xa3   :  { %521 = vmatmul.mubr.msk.f32.vlgmr.msra.gmra.mrb[0].mxu0 %vm34_vm0, %v31_v16 }
  0xa4   :  { %432 = vmatpush1.msra.mxu0 %v40_v6  ;;  %495 = vmatprep.mubr.f32.mxu0 %v588_v1 }
  0xa7   :  { %520 = vmatmul.mubr.msk.f32.vlgmr.msra.gmra.mrb[0].mxu1 %vm34_vm0, %v31_v16 }
  0xa8   :  { %203 = vmatpush1.msra.mxu1 %v123_v13  ;;  %266 = vmatprep.mubr.f32.mxu1 %v588_v1 }
  0xab   :  { %522 = vmatmul.mubr.msk.f32.vlgmr.msra.gmra.mrb[0].mxu0 %vm34_vm0, %v31_v16 }
  0xaf   :  { %269 = vmatmul.mubr.f32.vlgmr.msra.gmra.mrb[0].mxu1 %v106_v18 }
 0x17e   :  { %v498_v24 = vpop.f32.mrb[0].mxu0 }
 0x17f   :  { %v500_v25 = vpop.f32.mrb[1].mxu0 }
 0x182   :  { %v270_v26 = vpop.f32.mrb[0].mxu1 }
 0x183   :  { %v523_v27 = vadd.f32 %v498_v24, %v270_v26  ;;  %v272_v28 = vpop.f32.mrb[1].mxu1 }
 0x184   :  { %v524_v29 = vadd.f32 %v500_v25, %v272_v28 }
 0x185   :  { %503 = vst [vmem:[#allocation5] sm:$0xff] %v523_v27 }
 0x186   :  { %504 = vst [vmem:[#allocation5 + $0x8] sm:$0xff] %v524_v29 }
 0x187   :  { %571 = shalt.err (!%p568_p12)
}
 0x188   :  { %s572_s26 = scalar_lea.hbm %s638_s2, 256 }
 0x189   :  { %p573_p13 = scmp.ne.s32.totalorder %s638_s2, %s572_s26  ;;  %p576_p0 = scmp.lt.u32.totalorder %s572_s26, %s638_s2 }
 0x18b   :  { %p578_p1 = pnand %p576_p0, %p573_p13 }
 0x18d   :  { %581 = shalt.err (!%p578_p1)
}
 0x18e   :  { %514 = dma.vmem_to_hbm [thread:$0]  %s512_s1, 256, %s638_s2, [#allocation4]  }
 0x18f   :  { %584 = dma.done.wait [#allocation4], 256  }
 0x190   :  { %585 = vsyncadd [#allocation4], 4294967040 }
 0x191   :  { %518 = vsyncpa [#allocation3], 1 }
 0x192   :  { %519 = vsyncpa [#allocation4], 1 }

</bundles_post_ra>
